<compile_context>
chip_gen: v5e
topology: v5e:2x2
jax: 0.10.0
libtpu: 0.0.40
codegen_flags: <defaults>
</compile_context>

<pallas_src>
import jax
import jax.numpy as jnp
from jax.experimental import pallas as pl
from jax.experimental.pallas import tpu as pltpu


def _round_up(x, m):
    return (x + m - 1) // m * m


def _make_kernel(approx_reciprocal):
    def kernel(x_ref, w_ref, b_ref, o_ref):
        # logits = x @ W_t + b ; W_t is (input_dim, cls_pad), lane-dense along
        # classes so the output store is an unmasked full-lane vst.
        logits = jnp.dot(
            x_ref[...], w_ref[...], preferred_element_type=jnp.float32
        ) + b_ref[...]  # b_ref is (1, cls_pad) f32, broadcasts over batch rows

        # Numerically-stable row softmax over the (padded) class axis, all f32.
        m = jnp.max(logits, axis=-1, keepdims=True)
        e = jnp.exp(logits - m)
        denom = jnp.sum(e, axis=-1, keepdims=True)
        # approx=True lowers the divide to the otherwise-idle EUP vrcp slot.
        inv = pl.reciprocal(denom, approx=approx_reciprocal)
        o_ref[...] = (e * inv).astype(o_ref.dtype)

    return kernel


def prepare_linear_params(weight, bias, *, matmul_dtype=jnp.bfloat16):
    """One-time weight transpose/pad + bias pad.

    For static (inference) weights call this once outside the step function and
    feed the result to linear_softmax_prepared (avoids the O(input_dim*cls_num)
    transpose/pad HBM traffic on every call).
    """
    cls_num, input_dim = weight.shape
    cn_pad = _round_up(cls_num, 128)  # lane-dense class axis (full vst stores)
    w_t = (
        jnp.zeros((input_dim, cn_pad), matmul_dtype)
        .at[:, :cls_num]
        .set(weight.astype(matmul_dtype).T)
    )
    # Padded classes: zero weight columns + a huge negative bias so exp()
    # underflows to exactly 0 and they never perturb the softmax normalization.
    b2d = (
        jnp.full((1, cn_pad), -1e30, jnp.float32)
        .at[0, :cls_num]
        .set(bias.astype(jnp.float32))
    )
    return w_t, b2d, cls_num


def linear_softmax_prepared(x, w_t, b2d, cls_num, *, tm=512,
                            out_dtype=jnp.float32, approx_reciprocal=True):
    batch, input_dim = x.shape
    cn_pad = w_t.shape[1]
    eb = jnp.dtype(w_t.dtype).itemsize   # matmul operand bytes (2 bf16 / 4 f32)
    ob = jnp.dtype(out_dtype).itemsize   # output bytes

    # ---- per-generation VMEM budget -> batch-tile clamp ----
    try:
        vmem_cap = int(pltpu.get_tpu_info().vmem_capacity_bytes)
    except Exception:
        vmem_cap = 64 * 1024 * 1024      # conservative (v7x) fallback
    vmem_budget = int(vmem_cap * 0.85)   # headroom for compiler temporaries

    fixed = input_dim * cn_pad * eb + 2 * cn_pad * 4              # resident W_t + bias
    per_row = 2 * input_dim * eb + 2 * cn_pad * ob + 2 * cn_pad * 4  # x/out dbl-buf + f32 temps
    if vmem_budget > fixed + 8 * per_row:
        tm_cap = (vmem_budget - fixed) // per_row
    else:
        # TODO(synk): weight too large to stay resident -> class-tiled
        # streaming / online-softmax variant needed; use minimal tile for now.
        tm_cap = 8

    tm = int(min(tm, _round_up(batch, 8), tm_cap))
    if tm >= 256:
        tm = (tm // 256) * 256           # v6e/v7x MXU-native tile height
    else:
        tm = max(8, (tm // 8) * 8)

    x_p = x.astype(w_t.dtype)
    b_pad = _round_up(batch, tm)
    if b_pad != batch:
        x_p = jnp.pad(x_p, ((0, b_pad - batch), (0, 0)))

    est_bytes = fixed + per_row * tm
    vmem_limit = int(min(vmem_budget, max(32 * 1024 * 1024, 2 * est_bytes)))

    cost = pl.CostEstimate(
        flops=2 * b_pad * input_dim * cn_pad,
        transcendentals=b_pad * cn_pad,
        bytes_accessed=(b_pad * input_dim * eb + input_dim * cn_pad * eb
                        + cn_pad * 4 + b_pad * cn_pad * ob),
    )

    kernel = _make_kernel(approx_reciprocal)

    def build(single_buffer_params):
        pm = {"pipeline_mode": pl.Buffered(1)} if single_buffer_params else {}
        return pl.pallas_call(
            kernel,
            out_shape=jax.ShapeDtypeStruct((b_pad, cn_pad), out_dtype),
            grid_spec=pltpu.PrefetchScalarGridSpec(
                num_scalar_prefetch=0,
                grid=(b_pad // tm,),
                in_specs=[
                    # x: one batch tile per grid step (pipelined, double-buffered).
                    pl.BlockSpec((tm, input_dim), lambda i: (i, 0)),
                    # weight / bias: constant index -> resident; single-buffered
                    # so they cost 1x VMEM instead of 2x.
                    pl.BlockSpec((input_dim, cn_pad), lambda i: (0, 0), **pm),
                    pl.BlockSpec((1, cn_pad), lambda i: (0, 0), **pm),
                ],
                out_specs=pl.BlockSpec((tm, cn_pad), lambda i: (i, 0)),
            ),
            compiler_params=pltpu.CompilerParams(
                # Batch tiles are independent -> shard across TensorCores (v7x).
                dimension_semantics=("parallel",),
                vmem_limit_bytes=vmem_limit,
            ),
            cost_estimate=cost,
        )

    try:
        out = build(True)(x_p, w_t, b2d)
    except Exception:
        # Fallback for JAX builds that reject pipeline_mode=pl.Buffered(1) on a
        # top-level pallas_call BlockSpec (costs 2x VMEM for the resident weight).
        out = build(False)(x_p, w_t, b2d)

    # Strip batch/class padding (padded-class probabilities are exactly 0, so
    # the kept columns already sum to 1).
    return out[:batch, :cls_num]


def linear_softmax(x, weight, bias, *, matmul_dtype=jnp.bfloat16, tm=512,
                   out_dtype=jnp.float32, approx_reciprocal=True):
    """softmax(x @ weight.T + bias, axis=1) as a Pallas TPU kernel."""
    w_t, b2d, cls_num = prepare_linear_params(weight, bias, matmul_dtype=matmul_dtype)
    return linear_softmax_prepared(
        x, w_t, b2d, cls_num, tm=tm, out_dtype=out_dtype,
        approx_reciprocal=approx_reciprocal)


if __name__ == "__main__":
    # Small shapes consistent with the module: Linear(input_dim -> cls_num)
    batch, input_dim, cls_num = 8, 32, 16

    key = jax.random.PRNGKey(0)
    kx, kw, kb = jax.random.split(key, 3)

    # Deterministic init mimicking nn.Linear default: U(-1/sqrt(in), 1/sqrt(in))
    bound = 1.0 / (input_dim ** 0.5)
    weight = jax.random.uniform(
        kw, (cls_num, input_dim), jnp.float32, minval=-bound, maxval=bound
    )
    bias = jax.random.uniform(
        kb, (cls_num,), jnp.float32, minval=-bound, maxval=bound
    )
    x = jax.random.normal(kx, (batch, input_dim), jnp.float32)

    ref = jax.nn.softmax(x @ weight.T + bias, axis=1)

    # Perf-default path: bf16 matmul operands + approx reciprocal.
    out = jax.block_until_ready(linear_softmax(x, weight, bias))
    assert out.shape == (batch, cls_num)
    assert jnp.allclose(out, ref, atol=2e-2, rtol=2e-2)
    assert jnp.allclose(jnp.sum(out, axis=1), 1.0, atol=1e-2)

    # Strict-parity path: f32 operands + exact reciprocal.
    out_strict = jax.block_until_ready(
        linear_softmax(x, weight, bias,
                       matmul_dtype=jnp.float32, approx_reciprocal=False))
    assert jnp.allclose(out_strict, ref, atol=1e-5, rtol=1e-5)
    assert jnp.allclose(jnp.sum(out_strict, axis=1), 1.0, atol=1e-5)

    print("KERNEL_OK")
</pallas_src>

<mosaic_0001>
module attributes {stable_mosaic.version = 11 : i64} {
  func.func @kernel(%arg0: i32, %arg1: memref<8x32xbf16, #tpu.memory_space<vmem>>, %arg2: memref<32x128xbf16, #tpu.memory_space<vmem>>, %arg3: memref<1x128xf32, #tpu.memory_space<vmem>>, %arg4: memref<8x128xf32, #tpu.memory_space<vmem>>) attributes {dimension_semantics = [#tpu.dimension_semantics<parallel>], iteration_bounds = array<i64: 1>, scalar_prefetch = 0 : i64, scratch_operands = 0 : i64, tpu.core_type = #tpu.core_type<tc>, window_params = [{transform_indices = @transform_0, window_bounds = array<i64: 8, 32>}, {pipeline_mode = #tpu.pipeline_mode<synchronous>, transform_indices = @transform_1, window_bounds = array<i64: 32, 128>}, {pipeline_mode = #tpu.pipeline_mode<synchronous>, transform_indices = @transform_2, window_bounds = array<i64: 1, 128>}, {transform_indices = @transform_3, window_bounds = array<i64: 8, 128>}]} {
    %c0 = arith.constant 0 : index
    %c0_0 = arith.constant 0 : index
    %0 = vector.load %arg1[%c0, %c0_0] : memref<8x32xbf16, #tpu.memory_space<vmem>>, vector<8x32xbf16>
    %c0_1 = arith.constant 0 : index
    %c0_2 = arith.constant 0 : index
    %1 = vector.load %arg2[%c0_1, %c0_2] : memref<32x128xbf16, #tpu.memory_space<vmem>>, vector<32x128xbf16>
    %cst = arith.constant dense<0.000000e+00> : vector<8x128xf32>
    %2 = tpu.matmul %0, %1, %cst {dimension_numbers = #tpu.dot_dimension_numbers<[1], [0], [0], [1], [0, 0, 1, 1], [], []>} : vector<8x32xbf16>, vector<32x128xbf16>, vector<8x128xf32> -> vector<8x128xf32>
    %c0_3 = arith.constant 0 : index
    %c0_4 = arith.constant 0 : index
    %3 = vector.load %arg3[%c0_3, %c0_4] : memref<1x128xf32, #tpu.memory_space<vmem>>, vector<1x128xf32>
    %4 = vector.broadcast %3 : vector<1x128xf32> to vector<8x128xf32>
    %5 = arith.addf %2, %4 : vector<8x128xf32>
    %cst_5 = arith.constant dense<0xFF800000> : vector<8xf32>
    %6 = vector.multi_reduction <maximumf>, %5, %cst_5 [1] : vector<8x128xf32> to vector<8xf32>
    %7 = vector.shape_cast %6 : vector<8xf32> to vector<8x1xf32>
    %8 = vector.broadcast %7 : vector<8x1xf32> to vector<8x128xf32>
    %9 = arith.subf %5, %8 : vector<8x128xf32>
    %10 = math.exp %9 : vector<8x128xf32>
    %cst_6 = arith.constant dense<0.000000e+00> : vector<8xf32>
    %11 = vector.multi_reduction <add>, %10, %cst_6 [1] : vector<8x128xf32> to vector<8xf32>
    %12 = vector.shape_cast %11 : vector<8xf32> to vector<8x1xf32>
    %13 = tpu.reciprocal %12 {approx = true} : vector<8x1xf32> -> vector<8x1xf32>
    %14 = vector.broadcast %13 : vector<8x1xf32> to vector<8x128xf32>
    %15 = arith.mulf %10, %14 : vector<8x128xf32>
    %c0_7 = arith.constant 0 : index
    %c0_8 = arith.constant 0 : index
    %16 = vector.load %arg4[%c0_7, %c0_8] : memref<8x128xf32, #tpu.memory_space<vmem>>, vector<8x128xf32>
    tpu.vector_store %arg4[%c0_7, %c0_8], %15 {strides = array<i32>} : memref<8x128xf32, #tpu.memory_space<vmem>>, vector<8x128xf32>,
    return
  }
  func.func @transform_0(%arg0: i32) -> (i32, i32) {
    %c0_i32 = arith.constant 0 : i32
    %c0_i32_0 = arith.constant 0 : i32
    return %arg0, %c0_i32 : i32, i32
  }
  func.func @transform_1(%arg0: i32) -> (i32, i32) {
    %c0_i32 = arith.constant 0 : i32
    %c0_i32_0 = arith.constant 0 : i32
    %c0_i32_1 = arith.constant 0 : i32
    return %c0_i32, %c0_i32_0 : i32, i32
  }
  func.func @transform_2(%arg0: i32) -> (i32, i32) {
    %c0_i32 = arith.constant 0 : i32
    %c0_i32_0 = arith.constant 0 : i32
    %c0_i32_1 = arith.constant 0 : i32
    return %c0_i32, %c0_i32_0 : i32, i32
  }
  func.func @transform_3(%arg0: i32) -> (i32, i32) {
    %c0_i32 = arith.constant 0 : i32
    %c0_i32_0 = arith.constant 0 : i32
    return %arg0, %c0_i32 : i32, i32
  }
}

module attributes {stable_mosaic.version = 11 : i64} {
  func.func @kernel(%arg0: i32, %arg1: memref<8x32xbf16, #tpu.memory_space<vmem>>, %arg2: memref<32x128xbf16, #tpu.memory_space<vmem>>, %arg3: memref<1x128xf32, #tpu.memory_space<vmem>>, %arg4: memref<8x128xf32, #tpu.memory_space<vmem>>) attributes {dimension_semantics = [#tpu.dimension_semantics<parallel>], iteration_bounds = array<i64: 1>, scalar_prefetch = 0 : i64, scratch_operands = 0 : i64, tpu.core_type = #tpu.core_type<tc>, window_params = [{transform_indices = @transform_0, window_bounds = array<i64: 8, 32>}, {pipeline_mode = #tpu.pipeline_mode<synchronous>, transform_indices = @transform_1, window_bounds = array<i64: 32, 128>}, {pipeline_mode = #tpu.pipeline_mode<synchronous>, transform_indices = @transform_2, window_bounds = array<i64: 1, 128>}, {transform_indices = @transform_3, window_bounds = array<i64: 8, 128>}]} {
    %c0 = arith.constant 0 : index
    %c0_0 = arith.constant 0 : index
    %0 = vector.load %arg1[%c0, %c0_0] : memref<8x32xbf16, #tpu.memory_space<vmem>>, vector<8x32xbf16>
    %c0_1 = arith.constant 0 : index
    %c0_2 = arith.constant 0 : index
    %1 = vector.load %arg2[%c0_1, %c0_2] : memref<32x128xbf16, #tpu.memory_space<vmem>>, vector<32x128xbf16>
    %cst = arith.constant dense<0.000000e+00> : vector<8x128xf32>
    %2 = tpu.matmul %0, %1, %cst {dimension_numbers = #tpu.dot_dimension_numbers<[1], [0], [0], [1], [0, 0, 1, 1], [], []>} : vector<8x32xbf16>, vector<32x128xbf16>, vector<8x128xf32> -> vector<8x128xf32>
    %c0_3 = arith.constant 0 : index
    %c0_4 = arith.constant 0 : index
    %3 = vector.load %arg3[%c0_3, %c0_4] : memref<1x128xf32, #tpu.memory_space<vmem>>, vector<1x128xf32>
    %4 = vector.broadcast %3 : vector<1x128xf32> to vector<8x128xf32>
    %5 = arith.addf %2, %4 : vector<8x128xf32>
    %cst_5 = arith.constant dense<0xFF800000> : vector<8xf32>
    %6 = vector.multi_reduction <maximumf>, %5, %cst_5 [1] : vector<8x128xf32> to vector<8xf32>
    %7 = vector.shape_cast %6 : vector<8xf32> to vector<8x1xf32>
    %8 = vector.broadcast %7 : vector<8x1xf32> to vector<8x128xf32>
    %9 = arith.subf %5, %8 : vector<8x128xf32>
    %10 = math.exp %9 : vector<8x128xf32>
    %cst_6 = arith.constant dense<0.000000e+00> : vector<8xf32>
    %11 = vector.multi_reduction <add>, %10, %cst_6 [1] : vector<8x128xf32> to vector<8xf32>
    %12 = vector.shape_cast %11 : vector<8xf32> to vector<8x1xf32>
    %13 = tpu.reciprocal %12 {approx = true} : vector<8x1xf32> -> vector<8x1xf32>
    %14 = vector.broadcast %13 : vector<8x1xf32> to vector<8x128xf32>
    %15 = arith.mulf %10, %14 : vector<8x128xf32>
    %c0_7 = arith.constant 0 : index
    %c0_8 = arith.constant 0 : index
    %16 = vector.load %arg4[%c0_7, %c0_8] : memref<8x128xf32, #tpu.memory_space<vmem>>, vector<8x128xf32>
    tpu.vector_store %arg4[%c0_7, %c0_8], %15 {strides = array<i32>} : memref<8x128xf32, #tpu.memory_space<vmem>>, vector<8x128xf32>,
    return
  }
  func.func @transform_0(%arg0: i32) -> (i32, i32) {
    %c0_i32 = arith.constant 0 : i32
    %c0_i32_0 = arith.constant 0 : i32
    return %arg0, %c0_i32 : i32, i32
  }
  func.func @transform_1(%arg0: i32) -> (i32, i32) {
    %c0_i32 = arith.constant 0 : i32
    %c0_i32_0 = arith.constant 0 : i32
    %c0_i32_1 = arith.constant 0 : i32
    return %c0_i32, %c0_i32_0 : i32, i32
  }
  func.func @transform_2(%arg0: i32) -> (i32, i32) {
    %c0_i32 = arith.constant 0 : i32
    %c0_i32_0 = arith.constant 0 : i32
    %c0_i32_1 = arith.constant 0 : i32
    return %c0_i32, %c0_i32_0 : i32, i32
  }
  func.func @transform_3(%arg0: i32) -> (i32, i32) {
    %c0_i32 = arith.constant 0 : i32
    %c0_i32_0 = arith.constant 0 : i32
    return %arg0, %c0_i32 : i32, i32
  }
}

</mosaic_0001>

<bundles_post_ra>
// kernel: tpu_custom_call.1
= control target key start
LH: loop header
LB: loop body
LE: loop exit
PB: predicated region body
PF: predicated region fallthrough
CT: control target
= control target key end

     0   :  { %8 = vsyncpa [#allocation3], 0  ;;  %s248_s0 = inlined_call_operand.hbm [shape: bf16[8,32], index: 0, kind: input, shape index: {}]   ;;  %s249_s1 = inlined_call_operand.hbm [shape: bf16[32,128], index: 1, kind: input, shape index: {}]   ;;  %s250_s2 = inlined_call_operand.vmem [shape: f32[1,128], index: 2, kind: input, shape index: {}]   ;;  %s251_s3 = inlined_call_operand.hbm [shape: f32[8,128], index: 3, kind: output, shape index: {}]  }
   0x1   :  { %9 = vsyncpa [#allocation6], 0 }
   0x2   :  { %10 = vsyncpa [#allocation4], 0  ;;  %s16_s14 = sshll.u32 %s248_s0, 4  ;;  %s211_s15 = smov [#allocation2]   ;;  %s17_s14 = int_to_ptr.hbm [resolvable:$true] %s16_s14 }
   0x3   :  { %s18_s16 = sshll.u32 %s211_s15, 4  ;;  %s26_s19 = sshll.u32 %s249_s1, 4  ;;  %s19_s16 = int_to_ptr.vmem [resolvable:$true] %s18_s16  ;;  %s27_s19 = int_to_ptr.hbm [resolvable:$true] %s26_s19 }
   0x4   :  { %21 = dma.hbm_to_vmem [thread:$0]  %s17_s14, 64, %s19_s16, [#allocation3]  }
   0x5   :  { %s212_s20 = smov [#allocation5]   ;;  %s213_s22 = smov 64  }
   0x6   :  { %s28_s21 = sshll.u32 %s212_s20, 4  ;;  %s214_s23 = smov 4   ;;  %s29_s21 = int_to_ptr.vmem [resolvable:$true] %s28_s21 }
   0x7   :  { %34 = dma.hbm_to_vmem [thread:$0]  %s27_s19, 256, %s29_s21, [#allocation6], %s213_s22, %s213_s22, %s214_s23  }
   0x8   :  { %205 = dma.done.wait [#allocation3], 64  }
   0x9   :  { %206 = vsyncadd [#allocation3], 4294967232 }
   0xa   :  { %207 = dma.done.wait [#allocation6], 256  }
   0xb   :  { %208 = vsyncadd [#allocation6], 4294967040  ;;  %v122_v0 = vld [vmem:[#allocation5 + $0x8] sm:$0xff]  ;;  %v121_v1 = vld [vmem:[#allocation5] sm:$0xff]  ;;  %vm67_vm0 = vcmask 261120   ;;  %s215_s24 = smov [#allocation7]  }
   0xc   :  { %77 = vmatpush.bf16.msra.mxu0 %v122_v0  ;;  %v46_v2 = vld [vmem:[#allocation2] sm:$0xf]  ;;  %s99_s25 = sshll.u32 %s215_s24, 4  ;;  %s101_s28 = sshll.u32 %s251_s3, 4  ;;  %s100_s25 = int_to_ptr.vmem [resolvable:$true] %s99_s25  ;;  %s102_s28 = int_to_ptr.hbm [resolvable:$true] %s101_s28 }
   0xd   :  { %v128_v3 = vld [vmem:[%s250_s2] ss:$0 sm:$0xff] }
  0x10   :  { %78 = vmatpush.bf16.msra.mxu0 %v121_v1 }
  0x13   :  { %120 = vmatmul.msk.bf16.vlgmr.msra.gmra.mxu0 %vm67_vm0, %v46_v2 }
  0x90   :  { %v80_v4 = vpop.f32.mrf.mxu0 }
  0x91   :  { %v81_v5 = vadd.f32 %v128_v3, %v80_v4 }
  0x93   :  { %84 = vmax.xlane.f32.xlu0 %v81_v5 }
  0x98   :  { %v82_v6 = vpop.f32.mrf.mxu0 }
 0x106   :  { %v85_v7 = vpop.xlane.xlu0 %84 }
 0x107   :  { %v86_v8 = vsub.f32 %v81_v5, %v85_v7 }
 0x109   :  { %v87_v9 = vmul.f32 1.442695, %v86_v8 }
 0x10b   :  { %129 = vpow2.f32 %v87_v9 }
 0x111   :  { %v130_v10 = vpop.eup %129 }
 0x112   :  { %89 = vadd.xlane.f32.xlu0 %v130_v10 }
 0x185   :  { %v90_v11 = vpop.xlane.xlu0 %89 }
 0x186   :  { %131 = vrcp.f32 %v90_v11 }
 0x18c   :  { %v132_v12 = vpop.eup %131 }
 0x18d   :  { %v92_v13 = vmul.f32 %v132_v12, %v130_v10 }
 0x18f   :  { %93 = vst [vmem:[#allocation7] sm:$0xff] %v92_v13 }
 0x190   :  { %104 = dma.vmem_to_hbm [thread:$0]  %s100_s25, 128, %s102_s28, [#allocation4]  }
 0x191   :  { %209 = dma.done.wait [#allocation4], 128  }
 0x192   :  { %210 = vsyncadd [#allocation4], 4294967168 }
 0x193   :  { %109 = vsyncpa [#allocation3], 1 }
 0x194   :  { %110 = vsyncpa [#allocation6], 1 }
 0x195   :  { %111 = vsyncpa [#allocation4], 1 }

// kernel: tpu_custom_call.1
= control target key start
LH: loop header
LB: loop body
LE: loop exit
PB: predicated region body
PF: predicated region fallthrough
CT: control target
= control target key end

     0   :  { %8 = vsyncpa [#allocation3], 0  ;;  %s248_s0 = inlined_call_operand.hbm [shape: bf16[8,32], index: 0, kind: input, shape index: {}]   ;;  %s249_s1 = inlined_call_operand.hbm [shape: bf16[32,128], index: 1, kind: input, shape index: {}]   ;;  %s250_s2 = inlined_call_operand.vmem [shape: f32[1,128], index: 2, kind: input, shape index: {}]   ;;  %s251_s3 = inlined_call_operand.hbm [shape: f32[8,128], index: 3, kind: output, shape index: {}]  }
   0x1   :  { %9 = vsyncpa [#allocation6], 0 }
   0x2   :  { %10 = vsyncpa [#allocation4], 0  ;;  %s16_s14 = sshll.u32 %s248_s0, 4  ;;  %s211_s15 = smov [#allocation2]   ;;  %s17_s14 = int_to_ptr.hbm [resolvable:$true] %s16_s14 }
   0x3   :  { %s18_s16 = sshll.u32 %s211_s15, 4  ;;  %s26_s19 = sshll.u32 %s249_s1, 4  ;;  %s19_s16 = int_to_ptr.vmem [resolvable:$true] %s18_s16  ;;  %s27_s19 = int_to_ptr.hbm [resolvable:$true] %s26_s19 }
   0x4   :  { %21 = dma.hbm_to_vmem [thread:$0]  %s17_s14, 64, %s19_s16, [#allocation3]  }
   0x5   :  { %s212_s20 = smov [#allocation5]   ;;  %s213_s22 = smov 64  }
   0x6   :  { %s28_s21 = sshll.u32 %s212_s20, 4  ;;  %s214_s23 = smov 4   ;;  %s29_s21 = int_to_ptr.vmem [resolvable:$true] %s28_s21 }
   0x7   :  { %34 = dma.hbm_to_vmem [thread:$0]  %s27_s19, 256, %s29_s21, [#allocation6], %s213_s22, %s213_s22, %s214_s23  }
   0x8   :  { %205 = dma.done.wait [#allocation3], 64  }
   0x9   :  { %206 = vsyncadd [#allocation3], 4294967232 }
   0xa   :  { %207 = dma.done.wait [#allocation6], 256  }
   0xb   :  { %208 = vsyncadd [#allocation6], 4294967040  ;;  %v122_v0 = vld [vmem:[#allocation5 + $0x8] sm:$0xff]  ;;  %v121_v1 = vld [vmem:[#allocation5] sm:$0xff]  ;;  %vm67_vm0 = vcmask 261120   ;;  %s215_s24 = smov [#allocation7]  }
   0xc   :  { %77 = vmatpush.bf16.msra.mxu0 %v122_v0  ;;  %v46_v2 = vld [vmem:[#allocation2] sm:$0xf]  ;;  %s99_s25 = sshll.u32 %s215_s24, 4  ;;  %s101_s28 = sshll.u32 %s251_s3, 4  ;;  %s100_s25 = int_to_ptr.vmem [resolvable:$true] %s99_s25  ;;  %s102_s28 = int_to_ptr.hbm [resolvable:$true] %s101_s28 }
   0xd   :  { %v128_v3 = vld [vmem:[%s250_s2] ss:$0 sm:$0xff] }
  0x10   :  { %78 = vmatpush.bf16.msra.mxu0 %v121_v1 }
  0x13   :  { %120 = vmatmul.msk.bf16.vlgmr.msra.gmra.mxu0 %vm67_vm0, %v46_v2 }
  0x90   :  { %v80_v4 = vpop.f32.mrf.mxu0 }
  0x91   :  { %v81_v5 = vadd.f32 %v128_v3, %v80_v4 }
  0x93   :  { %84 = vmax.xlane.f32.xlu0 %v81_v5 }
  0x98   :  { %v82_v6 = vpop.f32.mrf.mxu0 }
 0x106   :  { %v85_v7 = vpop.xlane.xlu0 %84 }
 0x107   :  { %v86_v8 = vsub.f32 %v81_v5, %v85_v7 }
 0x109   :  { %v87_v9 = vmul.f32 1.442695, %v86_v8 }
 0x10b   :  { %129 = vpow2.f32 %v87_v9 }
 0x111   :  { %v130_v10 = vpop.eup %129 }
 0x112   :  { %89 = vadd.xlane.f32.xlu0 %v130_v10 }
 0x185   :  { %v90_v11 = vpop.xlane.xlu0 %89 }
 0x186   :  { %131 = vrcp.f32 %v90_v11 }
 0x18c   :  { %v132_v12 = vpop.eup %131 }
 0x18d   :  { %v92_v13 = vmul.f32 %v132_v12, %v130_v10 }
 0x18f   :  { %93 = vst [vmem:[#allocation7] sm:$0xff] %v92_v13 }
 0x190   :  { %104 = dma.vmem_to_hbm [thread:$0]  %s100_s25, 128, %s102_s28, [#allocation4]  }
 0x191   :  { %209 = dma.done.wait [#allocation4], 128  }
 0x192   :  { %210 = vsyncadd [#allocation4], 4294967168 }
 0x193   :  { %109 = vsyncpa [#allocation3], 1 }
 0x194   :  { %110 = vsyncpa [#allocation6], 1 }
 0x195   :  { %111 = vsyncpa [#allocation4], 1 }

</bundles_post_ra>
